<compile_context>
chip_gen: v5e
topology: v5e:2x2
jax: 0.10.0
libtpu: 0.0.40
codegen_flags: <defaults>
</compile_context>

<pallas_src>
import jax
import jax.numpy as jnp
from jax.experimental import pallas as pl
from jax.experimental.pallas import tpu as pltpu

PAD_TOKEN_VAL = 0  # stand-in for cf.PAD_TOKEN_VAL


def _gather_kernel(ids_ref, table_hbm, out_ref, rowbuf, sems):
    """Gather one block of embedding rows via per-row DMA from HBM.

    ids_ref:   (N_pad,)  int32 in SMEM (scalar prefetch)
    table_hbm: (V, D)    float32 in HBM (pl.ANY) -- never fully loaded
    out_ref:   (T, D)    VMEM output block for this grid step
    rowbuf:    (T, D)    VMEM scratch the gathered rows land in
    sems:      (T,)      DMA semaphores, one per in-flight row copy
    """
    blk = pl.program_id(0)
    tpb = out_ref.shape[0]            # tokens per block (static)
    vocab = table_hbm.shape[0]

    @pl.loop(0, tpb)
    def _issue(t):
        # Clamp so a malformed id can never fault the DMA bounds check.
        # (PyTorch nn.Embedding would raise; previous one-hot kernel returned 0s.)
        row = jnp.clip(ids_ref[blk * tpb + t], 0, vocab - 1)
        pltpu.make_async_copy(
            table_hbm.at[pl.ds(row, 1), :],
            rowbuf.at[pl.ds(t, 1), :],
            sems.at[t],
        ).start()

    @pl.loop(0, tpb)
    def _wait(t):
        pltpu.make_async_copy(
            table_hbm.at[pl.ds(0, 1), :],   # src only provides shape for wait
            rowbuf.at[pl.ds(t, 1), :],
            sems.at[t],
        ).wait()

    out_ref[...] = rowbuf[...]


def embedding_forward(H, weight, *, tokens_per_block=None):
    """H: (B, S) int token ids. weight: (V, D) float32. Returns (B, S, D)."""
    B, S = H.shape
    V, D = weight.shape
    N = B * S

    if tokens_per_block is None:
        tokens_per_block = min(128, ((N + 7) // 8) * 8)
    T = max(8, ((tokens_per_block + 7) // 8) * 8)   # sublane-aligned block

    num_blocks = (N + T - 1) // T
    N_pad = num_blocks * T

    ids = H.reshape(N).astype(jnp.int32)
    if N_pad != N:
        ids = jnp.concatenate(
            [ids, jnp.full((N_pad - N,), PAD_TOKEN_VAL, jnp.int32)]
        )

    out_flat = pl.pallas_call(
        _gather_kernel,
        out_shape=jax.ShapeDtypeStruct((N_pad, D), weight.dtype),
        grid_spec=pltpu.PrefetchScalarGridSpec(
            num_scalar_prefetch=1,                         # ids -> SMEM
            grid=(num_blocks,),
            in_specs=[pl.BlockSpec(memory_space=pl.ANY)],  # table stays in HBM
            out_specs=pl.BlockSpec((T, D), lambda i, ids: (i, 0)),
            scratch_shapes=[
                pltpu.VMEM((T, D), weight.dtype),
                pltpu.SemaphoreType.DMA((T,)),
            ],
        ),
        compiler_params=pltpu.CompilerParams(
            dimension_semantics=("parallel",),             # split across TCs on v7x
        ),
    )(ids, weight)

    return out_flat[:N].reshape(B, S, D)


def init_embedding_weight(key, num_emb, emb_dim, padding_idx=PAD_TOKEN_VAL):
    # PyTorch nn.Embedding init: N(0, 1), with padding_idx row zeroed.
    w = jax.random.normal(key, (num_emb, emb_dim), dtype=jnp.float32)
    w = w.at[padding_idx, :].set(0.0)
    return w


if __name__ == "__main__":
    key = jax.random.PRNGKey(0)
    k_w, k_ids = jax.random.split(key)

    num_emb, emb_dim = 64, 128   # emb_dim multiple of 128 -> lane-dense stores
    B, S = 2, 8

    weight = init_embedding_weight(k_w, num_emb, emb_dim, PAD_TOKEN_VAL)
    # Token ids, include some padding tokens.
    H = jax.random.randint(k_ids, (B, S), 0, num_emb, dtype=jnp.int32)
    H = H.at[0, -2:].set(PAD_TOKEN_VAL)  # force a couple of pad tokens

    out = embedding_forward(H, weight, tokens_per_block=8)  # grid=(2,)
    out = jax.block_until_ready(out)

    # Reference check (plain JAX gather).
    ref = weight[H]
    assert out.shape == (B, S, emb_dim)
    assert jnp.allclose(out, ref, atol=1e-6), "mismatch vs reference gather"
    assert jnp.allclose(out[0, -1], 0.0), "padding_idx row should be zero"

    print("KERNEL_OK")
</pallas_src>

<mosaic_0001>
module attributes {stable_mosaic.version = 11 : i64} {
  func.func @_gather_kernel(%arg0: i32, %arg1: memref<16xi32, #tpu.memory_space<smem>>, %arg2: memref<64x128xf32, #tpu.memory_space<any>>, %arg3: memref<8x128xf32, #tpu.memory_space<vmem>>, %arg4: memref<8x128xf32, #tpu.memory_space<vmem>>, %arg5: memref<8x!tpu.dma_semaphore, #tpu.memory_space<semaphore_mem>>) attributes {dimension_semantics = [#tpu.dimension_semantics<parallel>], iteration_bounds = array<i64: 2>, scalar_prefetch = 1 : i64, scratch_operands = 2 : i64, tpu.core_type = #tpu.core_type<tc>, window_params = [{}, {transform_indices = @transform_1, window_bounds = array<i64: 8, 128>}]} {
    %c0_i32 = arith.constant 0 : i32
    %c8_i32 = arith.constant 8 : i32
    %0 = arith.addi %c0_i32, %c8_i32 : i32
    %c1_i32 = arith.constant 1 : i32
    scf.for %arg6 = %c0_i32 to %0 step %c1_i32  : i32 {
      %c1_i32_8 = arith.constant 1 : i32
      %4 = arith.muli %arg6, %c1_i32_8 : i32
      %c0_i32_9 = arith.constant 0 : i32
      %5 = arith.addi %c0_i32_9, %4 : i32
      %c8_i32_10 = arith.constant 8 : i32
      %6 = arith.muli %arg0, %c8_i32_10 : i32
      %7 = arith.addi %6, %5 : i32
      %8 = arith.index_cast %7 : i32 to index
      %9 = memref.load %arg1[%8] : memref<16xi32, #tpu.memory_space<smem>>
      %c0_i32_11 = arith.constant 0 : i32
      %c63_i32 = arith.constant 63 : i32
      %10 = arith.maxsi %c0_i32_11, %9 : i32
      %11 = arith.minsi %c63_i32, %10 : i32
      %c0_i32_12 = arith.constant 0 : i32
      %12 = tpu.memref_slice %arg2[%11, %c0_i32_12] : memref<64x128xf32, #tpu.memory_space<any>> -> memref<1x128xf32, #tpu.memory_space<any>>
      %c0_i32_13 = arith.constant 0 : i32
      %13 = tpu.memref_slice %arg4[%5, %c0_i32_13] : memref<8x128xf32, #tpu.memory_space<vmem>> -> memref<1x128xf32, #tpu.memory_space<vmem>>
      %14 = tpu.memref_slice %arg5[%5] : memref<8x!tpu.dma_semaphore, #tpu.memory_space<semaphore_mem>> -> memref<1x!tpu.dma_semaphore, #tpu.memory_space<semaphore_mem>>
      %15 = tpu.memref_squeeze %14 : memref<1x!tpu.dma_semaphore, #tpu.memory_space<semaphore_mem>> -> memref<!tpu.dma_semaphore, #tpu.memory_space<semaphore_mem>>
      tpu.enqueue_dma source(%12 : memref<1x128xf32, #tpu.memory_space<any>>) target(%13 : memref<1x128xf32, #tpu.memory_space<vmem>>) target_semaphore(%15 : memref<!tpu.dma_semaphore, #tpu.memory_space<semaphore_mem>>)
    }
    %c8_i32_0 = arith.constant 8 : i32
    %c0_i32_1 = arith.constant 0 : i32
    %c8_i32_2 = arith.constant 8 : i32
    %1 = arith.addi %c0_i32_1, %c8_i32_2 : i32
    %c1_i32_3 = arith.constant 1 : i32
    scf.for %arg6 = %c0_i32_1 to %1 step %c1_i32_3  : i32 {
      %c1_i32_8 = arith.constant 1 : i32
      %4 = arith.muli %arg6, %c1_i32_8 : i32
      %c0_i32_9 = arith.constant 0 : i32
      %5 = arith.addi %c0_i32_9, %4 : i32
      %c0_i32_10 = arith.constant 0 : i32
      %c0_i32_11 = arith.constant 0 : i32
      %6 = tpu.memref_slice %arg2[%c0_i32_10, %c0_i32_11] : memref<64x128xf32, #tpu.memory_space<any>> -> memref<1x128xf32, #tpu.memory_space<any>>
      %c0_i32_12 = arith.constant 0 : i32
      %7 = tpu.memref_slice %arg4[%5, %c0_i32_12] : memref<8x128xf32, #tpu.memory_space<vmem>> -> memref<1x128xf32, #tpu.memory_space<vmem>>
      %8 = tpu.memref_slice %arg5[%5] : memref<8x!tpu.dma_semaphore, #tpu.memory_space<semaphore_mem>> -> memref<1x!tpu.dma_semaphore, #tpu.memory_space<semaphore_mem>>
      %9 = tpu.memref_squeeze %8 : memref<1x!tpu.dma_semaphore, #tpu.memory_space<semaphore_mem>> -> memref<!tpu.dma_semaphore, #tpu.memory_space<semaphore_mem>>
      tpu.wait_dma2 semaphore(%9 : memref<!tpu.dma_semaphore, #tpu.memory_space<semaphore_mem>>) src(%6 : memref<1x128xf32, #tpu.memory_space<any>>) dst(%7 : memref<1x128xf32, #tpu.memory_space<vmem>>)
    }
    %c8_i32_4 = arith.constant 8 : i32
    %c0 = arith.constant 0 : index
    %c0_5 = arith.constant 0 : index
    %2 = vector.load %arg4[%c0, %c0_5] : memref<8x128xf32, #tpu.memory_space<vmem>>, vector<8x128xf32>
    %c0_6 = arith.constant 0 : index
    %c0_7 = arith.constant 0 : index
    %3 = vector.load %arg3[%c0_6, %c0_7] : memref<8x128xf32, #tpu.memory_space<vmem>>, vector<8x128xf32>
    tpu.vector_store %arg3[%c0_6, %c0_7], %2 {strides = array<i32>} : memref<8x128xf32, #tpu.memory_space<vmem>>, vector<8x128xf32>,
    return
  }
  func.func @transform_1(%arg0: i32, %arg1: memref<16xi32, #tpu.memory_space<smem>>) -> (i32, i32) {
    %c0_i32 = arith.constant 0 : i32
    %c0_i32_0 = arith.constant 0 : i32
    return %arg0, %c0_i32 : i32, i32
  }
}

</mosaic_0001>

<bundles_post_ra>
// kernel: tpu_custom_call.1
= control target key start
LH: loop header
LB: loop body
LE: loop exit
PB: predicated region body
PF: predicated region fallthrough
CT: control target
= control target key end

     0   :  { %s409_s12 = smov [#allocation5]   ;;  %s533_s0 = inlined_call_operand.hbm [shape: s32[16], index: 0, kind: input, shape index: {}]   ;;  %s534_s1 = inlined_call_operand.hbm [shape: f32[64,128], index: 1, kind: input, shape index: {}]   ;;  %s535_s2 = inlined_call_operand.hbm [shape: f32[16,128], index: 2, kind: output, shape index: {}]  }
   0x1   :  { %s8_s11 = sshll.u32 %s533_s0, 4  ;;  %s9_s11 = int_to_ptr.hbm [resolvable:$true] %s8_s11 }
   0x2   :  { %11 = dma.hbm_to_smem %s9_s11, 16, %s409_s12, [#allocation4] }
   0x3   :  { %381 = dma.done.wait [#allocation4], 16 }
   0x4   :  { %382 = vsyncadd [#allocation4], 4294967280 }
   0x5   :  { %14 = sfence }
   0x6   :  { %15 = vsyncpa [#allocation7], 0 }
   0x7   :  { %17 = vsyncpa [#allocation7 + $0x1], 0  ;;  %s429_s13 = smov 0   ;;  %s431_s14 = smov 0  }
   0x8   :  { %s433_s15 = smov 0  }
   0x9 LB: > { %s225_s0 = sadd.s32 4294967295, %s399_s15   ;;  %s446_s16 = sadd.s32 1, %s399_s15   ;;  %s399_s15 = sphi %s433_s15, %s540_s15   ;;  %s395_s14 = sphi %s431_s14, %s539_s14   ;;  %s391_s13 = sphi %s429_s13, %s538_s13  }
   0xa   : > { %s26_s17 = ssub.s32 %s399_s15, %s446_s16  ;;  %s29_s18 = sadd.s32 1, %s395_s14 }
   0xb   : > { %p27_p0 = scmp.eq.s32.totalorder %s26_s17, 0  ;;  %p226_p1 = scmp.ne.s32.totalorder %s26_s17, 0 }
   0xc   : > { %p33_p2 = scmp.eq.s32.totalorder %s399_s15, 1  ;;  %p38_p3 = scmp.ne.s32.totalorder %s395_s14, %s391_s13 }
   0xd   : > { %s455_s19 = scalar_select %p27_p0, %s395_s14, %s29_s18  }
   0xe   : > { %p457_p4 = por %p226_p1, %p33_p2  ;;  %p39_p5 = scmp.eq.s32.totalorder %s225_s0, 1 }
   0xf   : > { %p227_p7 = scmp.ge.s32.totalorder %s399_s15, 2 }
  0x10   : > { %p461_p6 = por %p39_p5, %p38_p3  ;;  %s53_s22 = sand.u32 (!%p227_p7), 1, %s395_s14  }
  0x11   : > { %48 = sbr.rel (%p227_p7) target bundleno = 82 (0x52), region = 12  ;;  %s469_s23 = sshll.u32 (!%p227_p7), %s53_s22, 3 }
  0x12   : > { %s55_s24 = scalar_lea.vmem (!%p227_p7), [#allocation6], %s469_s23  ;;  %s472_s25 = smov (!%p227_p7), 0  }
  0x16 LB: >> { %s229_s26 = sshll.u32 %s399_s15, 3  ;;  %s70_s29 = scalar_lea.vmem [#allocation2], %s403_s25  ;;  %s403_s25 = sphi %s472_s25, %s61_s25  }
  0x17   : >> { %s63_s27 = sadd.s32 %s403_s25, %s229_s26  ;;  %s482_s30 = sshll.u32 %s70_s29, 4  ;;  %s82_s30 = int_to_ptr.vmem [resolvable:$true] %s482_s30 }
  0x18   : >> { %s64_s28 = sld [smem:[#allocation5 + %s63_s27]]  ;;  %s71_s7 = scalar_lea.sflag [#allocation3], %s403_s25 }
  0x19   : >> { %s313_s12 = scalar_lea.hbm %s534_s1, 64 }
  0x1e   : >> { %p65_p8 = scmp.gt.s32.totalorder %s64_s28, 0  ;;  %p230_p9 = scmp.lt.s32.totalorder %s64_s28, 63 }
  0x20   : >> { %s542_s28 = smov (!%p65_p8, %s64_s28), 0 }
  0x21   : >> { %s544_s28 = smov (!%p230_p9, %s542_s28), 63 }
  0x22   : >> { %s69_s5 = scalar_lea.hbm %s534_s1, %s544_s28 }
  0x23   : >> { %s79_s6 = sshll.u32 %s69_s5, 4  ;;  %s80_s6 = int_to_ptr.hbm [resolvable:$true] %s79_s6 }
  0x24   : >> { %s309_s8 = sshra.s32 %s80_s6, 4  ;;  %s310_s8 = int_to_ptr.hbm [resolvable:$true] %s309_s8 }
  0x25   : >> { %s311_s9 = scalar_lea.hbm %s310_s8, 1  ;;  %p314_p11 = scmp.lt.s32.totalorder %s310_s8, %s534_s1 }
  0x26   : >> { %p312_p10 = scmp.ne.s32.totalorder %s310_s8, %s311_s9  ;;  %p315_p12 = scmp.lt.s32.totalorder %s313_s12, %s311_s9 }
  0x28   : >> { %p316_p13 = por %p315_p12, %p314_p11 }
  0x2a   : >> { %p317_p0 = pnand %p316_p13, %p312_p10 }
  0x2c   : >> { %320 = shalt.err (!%p317_p0)  }
  0x2d   : >> { %s321_s18 = sshra.s32 %s82_s30, 4  ;;  %s410_s28 = smov [#allocation2]   ;;  %s322_s18 = int_to_ptr.vmem [resolvable:$true] %s321_s18 }
  0x2e   : >> { %s323_s27 = scalar_lea.vmem %s322_s18, 1  ;;  %s325_s29 = scalar_lea.vmem %s410_s28, 8 }
  0x2f   : >> { %p324_p1 = scmp.ne.s32.totalorder %s322_s18, %s323_s27  ;;  %p326_p2 = scmp.lt.s32.totalorder %s322_s18, [#allocation2] }
  0x30   : >> { %p327_p3 = scmp.lt.s32.totalorder %s325_s29, %s323_s27 }
  0x32   : >> { %p328_p5 = por %p327_p3, %p326_p2 }
  0x34   : >> { %p329_p7 = pnand %p328_p5, %p324_p1 }
  0x36   : >> { %332 = shalt.err (!%p329_p7)  }
  0x37   : >> { %84 = dma.hbm_to_vmem [thread:$0]  %s80_s6, 16, %s82_s30, %s71_s7 }
  0x38   : >> { %s61_s25 = sadd.s32 1, %s403_s25  }
  0x39   : >> { %p58_p8 = scmp.ge.s32.totalorder %s61_s25, 8  }
  0x3a   : > { %s405_s3 = smov (%p58_p8), 0  }
  0x3b   : > { %60 = sbr.rel (!%p58_p8) target bundleno = 22 (0x16), region = 73 }
  0x40 LB: >> { %s91_s4 = scalar_lea.sflag [#allocation3], %s407_s3  ;;  %s407_s3 = sphi %s405_s3, %s90_s3  }
  0x41   : >> { %383 = dma.done.wait %s91_s4, 16 }
  0x42   : >> { %384 = vsyncadd %s91_s4, 4294967280  ;;  %s90_s3 = sadd.s32 1, %s407_s3  }
  0x43   : >> { %p87_p9 = scmp.ge.s32.totalorder %s90_s3, 8  }
  0x44   : > { %v95_v0 = vld [vmem:[#allocation2] sm:$0xff] (%p87_p9)  ;;  %s108_s25 = scalar_lea.hbm (%p87_p9), %s535_s2, %s229_s26  ;;  %s110_s6 = sshll.u32 (%p87_p9), %s55_s24, 4  ;;  %s111_s6 = int_to_ptr.vmem [resolvable:$true] %s110_s6 }
  0x45   : > { %89 = sbr.rel (!%p87_p9) target bundleno = 64 (0x40), region = 84  ;;  %96 = vst [vmem:[%s55_s24] sm:$0xff] (%p87_p9), %v95_v0  ;;  %s112_s7 = sshll.u32 (%p87_p9), %s108_s25, 4  ;;  %s113_s7 = int_to_ptr.hbm [resolvable:$true] %s112_s7 }
  0x46   : > { %s98_s8 = scalar_lea.sflag (%p87_p9), [#allocation7], %s53_s22  ;;  %s347_s9 = sshra.s32 (%p87_p9), %s113_s7, 4  ;;  %s348_s9 = int_to_ptr.hbm [resolvable:$true] %s347_s9 }
  0x47   : > { %s349_s10 = scalar_lea.hbm (%p87_p9), %s348_s9, 8  ;;  %s353_s26 = scalar_lea.hbm (%p87_p9), %s535_s2, 16 }
  0x48   : > { %p350_p10 = scmp.ne.s32.totalorder (%p87_p9), %s348_s9, %s349_s10  ;;  %p354_p13 = scmp.lt.s32.totalorder (%p87_p9), %s348_s9, %s535_s2 }
  0x49   : > { %p355_p0 = scmp.lt.s32.totalorder (%p87_p9), %s353_s26, %s349_s10 }
  0x4a   : > { %p351_p11 = pnand %p350_p10, %p457_p4 }
  0x4b   : > { %p356_p1 = por %p355_p0, %p354_p13 }
  0x4c   : > { %p352_p12 = pneg %p351_p11 }
  0x4e   : > { %p357_p2 = pnand %p356_p1, %p352_p12 }
  0x50   : > { %360 = shalt.err (!%p357_p2)
}
  0x51   : > { %249 = dma.vmem_to_hbm [thread:$0]  (%p457_p4), %s111_s6, 128, %s113_s7, %s98_s8  }
  0x52 PF: > { %p255_p3 = scmp.ge.s32.totalorder %s399_s15, 1  ;;  %s124_s22 = sand.u32 1, %s391_s13  }
  0x53   : > { %s125_s23 = scalar_lea.sflag [#allocation7], %s124_s22 }
  0x54   : > { %p252_p5 = pnand %p255_p3, %p461_p6 }
  0x56   : > { %p253_p7 = pneg %p252_p5 }
  0x58   : > { %386 = dma.done.wait (%p253_p7), %s125_s23, 128  }
  0x59   : > { %388 = vsyncadd (%p253_p7), %s125_s23, 4294967168  ;;  %p20_p8 = scmp.ge.s32.totalorder %s446_s16, 3   ;;  %s538_s13 = smov %s395_s14 }
  0x5a   : > { %s539_s14 = smov %s455_s19  ;;  %s540_s15 = smov %s446_s16 }
  0x5b   :  { %22 = sbr.rel (!%p20_p8) target bundleno = 9 (0x9), region = 95 }
  0x60   :  { %131 = vsyncpa [#allocation7], 1 }
  0x61   :  { %133 = vsyncpa [#allocation7 + $0x1], 1 }
  0x62   :  { %134 = vsyncmov [#allocation3] }
  0x65   :  { %s135_s15 = vpop.sfrf %134 }
  0x66   :  { %p239_p4 = scmp.ne.s32.totalorder %s135_s15, 0 }
  0x68   :  { %139 = shalt.err (%p239_p4)  }
  0x69   :  { %141 = vsyncmov [#allocation3 + $0x1] }
  0x6c   :  { %s142_s20 = vpop.sfrf %141 }
  0x6d   :  { %p240_p6 = scmp.ne.s32.totalorder %s142_s20, 0 }
  0x6f   :  { %146 = shalt.err (%p240_p6)  }
  0x70   :  { %148 = vsyncmov [#allocation3 + $0x2] }
  0x73   :  { %s149_s21 = vpop.sfrf %148 }
  0x74   :  { %p241_p9 = scmp.ne.s32.totalorder %s149_s21, 0 }
  0x76   :  { %153 = shalt.err (%p241_p9)  }
  0x77   :  { %155 = vsyncmov [#allocation3 + $0x3] }
  0x7a   :  { %s156_s24 = vpop.sfrf %155 }
  0x7b   :  { %p242_p10 = scmp.ne.s32.totalorder %s156_s24, 0 }
  0x7d   :  { %160 = shalt.err (%p242_p10)  }
  0x7e   :  { %162 = vsyncmov [#allocation3 + $0x4] }
  0x81   :  { %s163_s16 = vpop.sfrf %162 }
  0x82   :  { %p243_p11 = scmp.ne.s32.totalorder %s163_s16, 0 }
  0x84   :  { %167 = shalt.err (%p243_p11)  }
  0x85   :  { %169 = vsyncmov [#allocation3 + $0x5] }
  0x88   :  { %s170_s1 = vpop.sfrf %169 }
  0x89   :  { %p244_p12 = scmp.ne.s32.totalorder %s170_s1, 0 }
  0x8b   :  { %174 = shalt.err (%p244_p12)  }
  0x8c   :  { %176 = vsyncmov [#allocation3 + $0x6] }
  0x8f   :  { %s177_s2 = vpop.sfrf %176 }
  0x90   :  { %p245_p13 = scmp.ne.s32.totalorder %s177_s2, 0 }
  0x92   :  { %181 = shalt.err (%p245_p13)  }
  0x93   :  { %183 = vsyncmov [#allocation3 + $0x7] }
  0x96   :  { %s184_s13 = vpop.sfrf %183 }
  0x97   :  { %p246_p0 = scmp.ne.s32.totalorder %s184_s13, 0 }
  0x99   :  { %188 = shalt.err (%p246_p0)  }

</bundles_post_ra>
